<compile_context>
chip_gen: v5e
topology: v5e:2x2
jax: 0.10.0
libtpu: 0.0.40
codegen_flags: <defaults>
</compile_context>

<pallas_src>
import jax
import jax.numpy as jnp
from jax.experimental import pallas as pl
from jax.experimental.pallas import tpu as pltpu


def _testmodel_kernel(ids_ref, table_ref, out_ref):
    ids = ids_ref[...]        # (R, L) int32, slot-major rows: [pred x B, c1 x B, ..., c5 x B]
    table = table_ref[...]    # (V_pad, D_pad) float32, zero-padded
    R, L = ids.shape
    V, _ = table.shape
    B = R // 6

    # --- per-(slot, batch) token counts: int32 on the VPU, single hoisted iota --------
    iota_v = jax.lax.broadcasted_iota(jnp.int32, (R, V), 1)    # hoisted, reused across L
    counts_i = jnp.zeros((R, V), jnp.int32)
    for l in range(L):                                         # static unroll (L is compile-time)
        counts_i = counts_i + (ids[:, l:l + 1] == iota_v).astype(jnp.int32)
    counts = counts_i.astype(table.dtype)                      # exact (values <= L), one convert

    # --- gather + token-sum in one MXU matmul: (R, V) @ (V, D) -> (R, D) --------------
    # 1/L mean dropped (argmax-invariant rescale).  Padded vocab rows are never matched,
    # padded embedding lanes are zero, so results are unchanged.
    # (Cast counts/table to bf16 here for the MXU fast path if bit-agreement with the
    #  f32 reference can be relaxed; kept f32 so the toy-size argmax matches exactly.)
    sums = jnp.dot(counts, table, preferred_element_type=jnp.float32)   # (R, D)

    # --- scoring epilogue: contiguous pred / choice blocks, first-max argmax ----------
    pred = sums[:B, :]                                                   # (B, D)
    best = jnp.sum(pred * sums[B:2 * B, :], axis=-1, keepdims=True)      # (B, 1) choice 0
    idx = jnp.zeros((B, 1), jnp.int32)
    for s in range(2, 6):
        cur = jnp.sum(pred * sums[s * B:(s + 1) * B, :], axis=-1, keepdims=True)
        better = cur > best                                              # strict >: first-max
        idx = jnp.where(better, s - 1, idx)
        best = jnp.where(better, cur, best)

    # Lane-dense (B, 128) int32 output slab (unmasked stores); wrapper reads lane 0.
    out_ref[...] = jnp.broadcast_to(idx, out_ref.shape)


def prepare_table(table):
    """Pad the frozen embedding table to (8,128)-aligned shape once at init."""
    V, D = table.shape
    V_pad = pl.cdiv(V, 128) * 128
    D_pad = pl.cdiv(D, 128) * 128
    return jnp.pad(table, ((0, V_pad - V), (0, D_pad - D)))


def test_model_forward(ids, table_p):
    """ids: [B, 6, L] int32 (slot 0 = pred, slots 1..5 = c1..c5);
    table_p: pre-padded [V_pad, D_pad] f32 -> [B] int32 argmax over the 5 choices."""
    B, S, L = ids.shape
    assert S == 6, "expected 6 slots: pred, c1..c5"

    # Slot-major packing: contiguous pred / per-choice row blocks inside the kernel.
    ids_sm = jnp.transpose(ids, (1, 0, 2)).reshape(S * B, L)

    # Toy sizes: single gridless invocation, everything VMEM-resident on one TensorCore.
    # M = 6*B = 12 rows is far below an MXU tile, so a grid would only add step overhead.
    out = pl.pallas_call(
        _testmodel_kernel,
        out_shape=jax.ShapeDtypeStruct((B, 128), jnp.int32),
        in_specs=[
            pl.BlockSpec(memory_space=pltpu.MemorySpace.VMEM),
            pl.BlockSpec(memory_space=pltpu.MemorySpace.VMEM),
        ],
        out_specs=pl.BlockSpec(memory_space=pltpu.MemorySpace.VMEM),
    )(ids_sm, table_p)
    return out[:, 0]


def _reference(ids, table):
    # Pure-JAX reference mirroring the PyTorch forward.
    embeds = jnp.take(table, ids, axis=0)          # (B, 6, L, D)
    mean_embeds = jnp.mean(embeds, axis=2)         # (B, 6, D)
    pred = mean_embeds[:, 0:1, :]
    choices = mean_embeds[:, 1:, :]
    scores = jnp.sum(pred * choices, axis=-1)      # (B, 5)
    return jnp.argmax(scores, axis=-1).astype(jnp.int32)


if __name__ == "__main__":
    B, L, V, D = 2, 8, 64, 32   # batch, seq len, vocab, embedding dim

    key = jax.random.PRNGKey(0)
    k_emb, k_ids = jax.random.split(key)

    # Deterministic "pretrained" (frozen) embedding table.
    table = jax.random.normal(k_emb, (V, D), dtype=jnp.float32)

    # pred, c1..c5 token-id tensors, packed as ids[:, 0]=pred, ids[:, 1:]=choices.
    ids = jax.random.randint(k_ids, (B, 6, L), 0, V, dtype=jnp.int32)

    table_p = prepare_table(table)     # one-time pad, like nn.Embedding.from_pretrained

    result = test_model_forward(ids, table_p)
    jax.block_until_ready(result)

    ref = _reference(ids, table)
    assert result.shape == (B,)
    assert jnp.array_equal(result, ref), (result, ref)

    print("KERNEL_OK")
</pallas_src>

<mosaic_0001>
module attributes {stable_mosaic.version = 11 : i64} {
  func.func @_testmodel_kernel(%arg0: memref<12x8xi32, #tpu.memory_space<vmem>>, %arg1: memref<128x128xf32, #tpu.memory_space<vmem>>, %arg2: memref<2x128xi32, #tpu.memory_space<vmem>>) attributes {dimension_semantics = [], scalar_prefetch = 0 : i64, scratch_operands = 0 : i64, tpu.core_type = #tpu.core_type<tc>} {
    %c0 = arith.constant 0 : index
    %c0_0 = arith.constant 0 : index
    %0 = vector.load %arg0[%c0, %c0_0] : memref<12x8xi32, #tpu.memory_space<vmem>>, vector<12x8xi32>
    %c0_1 = arith.constant 0 : index
    %c0_2 = arith.constant 0 : index
    %1 = vector.load %arg1[%c0_1, %c0_2] : memref<128x128xf32, #tpu.memory_space<vmem>>, vector<128x128xf32>
    %2 = tpu.iota {dimensions = array<i32: 1>} : vector<12x128xi32>
    %c0_i32 = arith.constant 0 : i32
    %3 = vector.broadcast %c0_i32 : i32 to vector<12x128xi32>
    %4 = vector.extract_strided_slice %0 {offsets = [0, 0], sizes = [12, 1], strides = [1, 1]} : vector<12x8xi32> to vector<12x1xi32>
    %5 = vector.broadcast %4 : vector<12x1xi32> to vector<12x128xi32>
    %6 = arith.cmpi eq, %5, %2 : vector<12x128xi32>
    %7 = arith.extui %6 : vector<12x128xi1> to vector<12x128xi32>
    %8 = arith.addi %3, %7 : vector<12x128xi32>
    %9 = vector.extract_strided_slice %0 {offsets = [0, 1], sizes = [12, 1], strides = [1, 1]} : vector<12x8xi32> to vector<12x1xi32>
    %10 = vector.broadcast %9 : vector<12x1xi32> to vector<12x128xi32>
    %11 = arith.cmpi eq, %10, %2 : vector<12x128xi32>
    %12 = arith.extui %11 : vector<12x128xi1> to vector<12x128xi32>
    %13 = arith.addi %8, %12 : vector<12x128xi32>
    %14 = vector.extract_strided_slice %0 {offsets = [0, 2], sizes = [12, 1], strides = [1, 1]} : vector<12x8xi32> to vector<12x1xi32>
    %15 = vector.broadcast %14 : vector<12x1xi32> to vector<12x128xi32>
    %16 = arith.cmpi eq, %15, %2 : vector<12x128xi32>
    %17 = arith.extui %16 : vector<12x128xi1> to vector<12x128xi32>
    %18 = arith.addi %13, %17 : vector<12x128xi32>
    %19 = vector.extract_strided_slice %0 {offsets = [0, 3], sizes = [12, 1], strides = [1, 1]} : vector<12x8xi32> to vector<12x1xi32>
    %20 = vector.broadcast %19 : vector<12x1xi32> to vector<12x128xi32>
    %21 = arith.cmpi eq, %20, %2 : vector<12x128xi32>
    %22 = arith.extui %21 : vector<12x128xi1> to vector<12x128xi32>
    %23 = arith.addi %18, %22 : vector<12x128xi32>
    %24 = vector.extract_strided_slice %0 {offsets = [0, 4], sizes = [12, 1], strides = [1, 1]} : vector<12x8xi32> to vector<12x1xi32>
    %25 = vector.broadcast %24 : vector<12x1xi32> to vector<12x128xi32>
    %26 = arith.cmpi eq, %25, %2 : vector<12x128xi32>
    %27 = arith.extui %26 : vector<12x128xi1> to vector<12x128xi32>
    %28 = arith.addi %23, %27 : vector<12x128xi32>
    %29 = vector.extract_strided_slice %0 {offsets = [0, 5], sizes = [12, 1], strides = [1, 1]} : vector<12x8xi32> to vector<12x1xi32>
    %30 = vector.broadcast %29 : vector<12x1xi32> to vector<12x128xi32>
    %31 = arith.cmpi eq, %30, %2 : vector<12x128xi32>
    %32 = arith.extui %31 : vector<12x128xi1> to vector<12x128xi32>
    %33 = arith.addi %28, %32 : vector<12x128xi32>
    %34 = vector.extract_strided_slice %0 {offsets = [0, 6], sizes = [12, 1], strides = [1, 1]} : vector<12x8xi32> to vector<12x1xi32>
    %35 = vector.broadcast %34 : vector<12x1xi32> to vector<12x128xi32>
    %36 = arith.cmpi eq, %35, %2 : vector<12x128xi32>
    %37 = arith.extui %36 : vector<12x128xi1> to vector<12x128xi32>
    %38 = arith.addi %33, %37 : vector<12x128xi32>
    %39 = vector.extract_strided_slice %0 {offsets = [0, 7], sizes = [12, 1], strides = [1, 1]} : vector<12x8xi32> to vector<12x1xi32>
    %40 = vector.broadcast %39 : vector<12x1xi32> to vector<12x128xi32>
    %41 = arith.cmpi eq, %40, %2 : vector<12x128xi32>
    %42 = arith.extui %41 : vector<12x128xi1> to vector<12x128xi32>
    %43 = arith.addi %38, %42 : vector<12x128xi32>
    %44 = arith.sitofp %43 : vector<12x128xi32> to vector<12x128xf32>
    %cst = arith.constant dense<0.000000e+00> : vector<12x128xf32>
    %45 = tpu.matmul %44, %1, %cst {dimension_numbers = #tpu.dot_dimension_numbers<[1], [0], [0], [1], [0, 0, 1, 1], [], []>} : vector<12x128xf32>, vector<128x128xf32>, vector<12x128xf32> -> vector<12x128xf32>
    %46 = vector.extract_strided_slice %45 {offsets = [0, 0], sizes = [2, 128], strides = [1, 1]} : vector<12x128xf32> to vector<2x128xf32>
    %47 = vector.extract_strided_slice %45 {offsets = [2, 0], sizes = [2, 128], strides = [1, 1]} : vector<12x128xf32> to vector<2x128xf32>
    %48 = arith.mulf %46, %47 : vector<2x128xf32>
    %cst_3 = arith.constant dense<0.000000e+00> : vector<2xf32>
    %49 = vector.multi_reduction <add>, %48, %cst_3 [1] : vector<2x128xf32> to vector<2xf32>
    %50 = vector.shape_cast %49 : vector<2xf32> to vector<2x1xf32>
    %c0_i32_4 = arith.constant 0 : i32
    %51 = vector.broadcast %c0_i32_4 : i32 to vector<2x1xi32>
    %52 = vector.extract_strided_slice %45 {offsets = [4, 0], sizes = [2, 128], strides = [1, 1]} : vector<12x128xf32> to vector<2x128xf32>
    %53 = arith.mulf %46, %52 : vector<2x128xf32>
    %cst_5 = arith.constant dense<0.000000e+00> : vector<2xf32>
    %54 = vector.multi_reduction <add>, %53, %cst_5 [1] : vector<2x128xf32> to vector<2xf32>
    %55 = vector.shape_cast %54 : vector<2xf32> to vector<2x1xf32>
    %56 = arith.cmpf ogt, %55, %50 : vector<2x1xf32>
    %c1_i32 = arith.constant 1 : i32
    %57 = vector.broadcast %c1_i32 : i32 to vector<2x1xi32>
    %58 = arith.select %56, %57, %51 : vector<2x1xi1>, vector<2x1xi32>
    %59 = arith.select %56, %55, %50 : vector<2x1xi1>, vector<2x1xf32>
    %60 = vector.extract_strided_slice %45 {offsets = [6, 0], sizes = [2, 128], strides = [1, 1]} : vector<12x128xf32> to vector<2x128xf32>
    %61 = arith.mulf %46, %60 : vector<2x128xf32>
    %cst_6 = arith.constant dense<0.000000e+00> : vector<2xf32>
    %62 = vector.multi_reduction <add>, %61, %cst_6 [1] : vector<2x128xf32> to vector<2xf32>
    %63 = vector.shape_cast %62 : vector<2xf32> to vector<2x1xf32>
    %64 = arith.cmpf ogt, %63, %59 : vector<2x1xf32>
    %c2_i32 = arith.constant 2 : i32
    %65 = vector.broadcast %c2_i32 : i32 to vector<2x1xi32>
    %66 = arith.select %64, %65, %58 : vector<2x1xi1>, vector<2x1xi32>
    %67 = arith.select %64, %63, %59 : vector<2x1xi1>, vector<2x1xf32>
    %68 = vector.extract_strided_slice %45 {offsets = [8, 0], sizes = [2, 128], strides = [1, 1]} : vector<12x128xf32> to vector<2x128xf32>
    %69 = arith.mulf %46, %68 : vector<2x128xf32>
    %cst_7 = arith.constant dense<0.000000e+00> : vector<2xf32>
    %70 = vector.multi_reduction <add>, %69, %cst_7 [1] : vector<2x128xf32> to vector<2xf32>
    %71 = vector.shape_cast %70 : vector<2xf32> to vector<2x1xf32>
    %72 = arith.cmpf ogt, %71, %67 : vector<2x1xf32>
    %c3_i32 = arith.constant 3 : i32
    %73 = vector.broadcast %c3_i32 : i32 to vector<2x1xi32>
    %74 = arith.select %72, %73, %66 : vector<2x1xi1>, vector<2x1xi32>
    %75 = arith.select %72, %71, %67 : vector<2x1xi1>, vector<2x1xf32>
    %76 = vector.extract_strided_slice %45 {offsets = [10, 0], sizes = [2, 128], strides = [1, 1]} : vector<12x128xf32> to vector<2x128xf32>
    %77 = arith.mulf %46, %76 : vector<2x128xf32>
    %cst_8 = arith.constant dense<0.000000e+00> : vector<2xf32>
    %78 = vector.multi_reduction <add>, %77, %cst_8 [1] : vector<2x128xf32> to vector<2xf32>
    %79 = vector.shape_cast %78 : vector<2xf32> to vector<2x1xf32>
    %80 = arith.cmpf ogt, %79, %75 : vector<2x1xf32>
    %c4_i32 = arith.constant 4 : i32
    %81 = vector.broadcast %c4_i32 : i32 to vector<2x1xi32>
    %82 = arith.select %80, %81, %74 : vector<2x1xi1>, vector<2x1xi32>
    %83 = vector.shape_cast %82 : vector<2x1xi32> to vector<2x1xi32>
    %84 = vector.broadcast %83 : vector<2x1xi32> to vector<2x128xi32>
    %c0_9 = arith.constant 0 : index
    %c0_10 = arith.constant 0 : index
    %85 = vector.load %arg2[%c0_9, %c0_10] : memref<2x128xi32, #tpu.memory_space<vmem>>, vector<2x128xi32>
    tpu.vector_store %arg2[%c0_9, %c0_10], %84 {strides = array<i32>} : memref<2x128xi32, #tpu.memory_space<vmem>>, vector<2x128xi32>,
    return
  }
}

</mosaic_0001>

<bundles_post_ra>
// kernel: tpu_custom_call.1
= control target key start
LH: loop header
LB: loop body
LE: loop exit
PB: predicated region body
PF: predicated region fallthrough
CT: control target
= control target key end

     0   :  { %7 = vsyncpa [#allocation3], 0  ;;  %s388_s0 = inlined_call_operand.vmem [shape: s32[12,8], index: 0, kind: input, shape index: {}]   ;;  %s389_s1 = inlined_call_operand.hbm [shape: f32[128,128], index: 1, kind: input, shape index: {}]   ;;  %s390_s2 = inlined_call_operand.hbm [shape: s32[2,128], index: 2, kind: output, shape index: {}]  }
   0x1   :  { %8 = vsyncpa [#allocation4], 0  ;;  %s15_s11 = sshll.u32 %s389_s1, 4  ;;  %s322_s12 = smov [#allocation2]   ;;  %s16_s11 = int_to_ptr.hbm [resolvable:$true] %s15_s11 }
   0x2   :  { %s17_s13 = sshll.u32 %s322_s12, 4  ;;  %s323_s14 = smov 128   ;;  %s18_s13 = int_to_ptr.vmem [resolvable:$true] %s17_s13 }
   0x3   :  { %s324_s15 = smov 8  }
   0x4   :  { %23 = dma.hbm_to_vmem [thread:$0]  %s16_s11, 2048, %s18_s13, [#allocation3], %s323_s14, %s323_s14, %s324_s15  }
   0x5   :  { %318 = dma.done.wait [#allocation3], 2048  }
   0x6   :  { %319 = vsyncadd [#allocation3], 4294965248  ;;  %v325_v0 = vmov 2   ;;  %v326_v1 = vmov 0   ;;  %v28_v2 = vld [vmem:[%s388_s0] sm:$0xff]  ;;  %v327_v4 = vmov 3   ;;  %v46_v29 = vlaneseq }
   0x7   :  { %257 = vset.pattern.permute.xlu1 %v325_v0  ;;  %255 = vset.pattern.permute.xlu0 %v326_v1  ;;  %v29_v3 = vld [vmem:[%s388_s0 + $0x8] sm:$0xf]  ;;  %v328_v5 = vmov 1   ;;  %v329_v6 = vmov 4   ;;  %v330_v7 = vmov 5   ;;  %v331_v8 = vmov 6  }
   0x8   :  { %259 = vset.pattern.permute.xlu2 %v326_v1  ;;  %71 = vperm.xlu1 %257, %v28_v2   ;;  %v332_v9 = vmov 7   ;;  %v45_v10 = vld [vmem:[#allocation2 + $0x78] sm:$0xff]  ;;  %v44_v11 = vld [vmem:[#allocation2 + $0x70] sm:$0xff]  ;;  %v43_v12 = vld [vmem:[#allocation2 + $0x68] sm:$0xff]  ;;  %v47_v32 = vand.u32 127, %v46_v29  ;;  %s333_s0 = smov [#allocation5]  }
   0x9   :  { %49 = vperm.xlu0 %255, %v28_v2   ;;  %52 = vperm.xlu2 %259, %v29_v3   ;;  %v42_v13 = vld [vmem:[#allocation2 + $0x60] sm:$0xff]  ;;  %v41_v14 = vld [vmem:[#allocation2 + $0x58] sm:$0xff]  ;;  %v40_v15 = vld [vmem:[#allocation2 + $0x50] sm:$0xff]  ;;  %s215_s19 = sshll.u32 %s333_s0, 4  ;;  %s217_s22 = sshll.u32 %s390_s2, 4  ;;  %s216_s19 = int_to_ptr.vmem [resolvable:$true] %s215_s19  ;;  %s218_s22 = int_to_ptr.hbm [resolvable:$true] %s217_s22 }
   0xa   :  { %144 = vmatpush.msra.mxu0 %v45_v10  ;;  %227 = vmatpush.msra.mxu1 %v45_v10  ;;  %v39_v17 = vld [vmem:[#allocation2 + $0x48] sm:$0xff]  ;;  %v38_v18 = vld [vmem:[#allocation2 + $0x40] sm:$0xff]  ;;  %v37_v19 = vld [vmem:[#allocation2 + $0x38] sm:$0xff] }
   0xb   :  { %v36_v20 = vld [vmem:[#allocation2 + $0x30] sm:$0xff]  ;;  %v35_v21 = vld [vmem:[#allocation2 + $0x28] sm:$0xff]  ;;  %v34_v23 = vld [vmem:[#allocation2 + $0x20] sm:$0xff] }
   0xc   :  { %145 = vmatpush.msra.mxu0 %v44_v11  ;;  %228 = vmatpush.msra.mxu1 %v44_v11  ;;  %v33_v24 = vld [vmem:[#allocation2 + $0x18] sm:$0xff]  ;;  %v32_v25 = vld [vmem:[#allocation2 + $0x10] sm:$0xff]  ;;  %v31_v26 = vld [vmem:[#allocation2 + $0x8] sm:$0xff] }
   0xd   :  { %v30_v27 = vld [vmem:[#allocation2] sm:$0xff] }
   0xe   :  { %146 = vmatpush.msra.mxu0 %v43_v12  ;;  %229 = vmatpush.msra.mxu1 %v43_v12 }
  0x10   :  { %258 = vset.pattern.permute.xlu1 %v327_v4  ;;  %147 = vmatpush.msra.mxu0 %v42_v13 }
  0x11   :  { %256 = vset.pattern.permute.xlu0 %v328_v5  ;;  %83 = vperm.xlu1 %258, %v28_v2  }
  0x12   :  { %59 = vperm.xlu0 %256, %v28_v2   ;;  %260 = vset.pattern.permute.xlu2 %v328_v5 }
  0x13   :  { %62 = vperm.xlu2 %260, %v29_v3   ;;  %230 = vmatpush.msra.mxu1 %v42_v13 }
  0x14   :  { %148 = vmatpush.msra.mxu0 %v41_v14 }
  0x15   :  { %231 = vmatpush.msra.mxu1 %v41_v14 }
  0x16   :  { %149 = vmatpush.msra.mxu0 %v40_v15 }
  0x17   :  { %232 = vmatpush.msra.mxu1 %v40_v15 }
  0x18   :  { %150 = vmatpush.msra.mxu0 %v39_v17 }
  0x19   :  { %261 = vset.pattern.permute.xlu1 %v329_v6  ;;  %233 = vmatpush.msra.mxu1 %v39_v17 }
  0x1a   :  { %263 = vset.pattern.permute.xlu0 %v330_v7  ;;  %95 = vperm.xlu1 %261, %v28_v2  }
  0x1b   :  { %107 = vperm.xlu0 %263, %v28_v2   ;;  %262 = vset.pattern.permute.xlu2 %v325_v0 }
  0x1c   :  { %74 = vperm.xlu2 %262, %v29_v3   ;;  %151 = vmatpush.msra.mxu0 %v38_v18 }
  0x1d   :  { %234 = vmatpush.msra.mxu1 %v38_v18 }
  0x1e   :  { %152 = vmatpush.msra.mxu0 %v37_v19 }
  0x1f   :  { %235 = vmatpush.msra.mxu1 %v37_v19 }
  0x20   :  { %153 = vmatpush.msra.mxu0 %v36_v20 }
  0x21   :  { %236 = vmatpush.msra.mxu1 %v36_v20 }
  0x22   :  { %264 = vset.pattern.permute.xlu1 %v327_v4  ;;  %154 = vmatpush.msra.mxu0 %v35_v21 }
  0x23   :  { %110 = vperm.xlu0 %263, %v29_v3   ;;  %86 = vperm.xlu1 %264, %v29_v3  }
  0x24   :  { %265 = vset.pattern.permute.xlu2 %v331_v8  ;;  %237 = vmatpush.msra.mxu1 %v35_v21 }
  0x25   :  { %119 = vperm.xlu2 %265, %v28_v2   ;;  %155 = vmatpush.msra.mxu0 %v34_v23 }
  0x26   :  { %238 = vmatpush.msra.mxu1 %v34_v23 }
  0x27   :  { %156 = vmatpush.msra.mxu0 %v33_v24 }
  0x28   :  { %239 = vmatpush.msra.mxu1 %v33_v24 }
  0x29   :  { %157 = vmatpush.msra.mxu0 %v32_v25 }
  0x2a   :  { %240 = vmatpush.msra.mxu1 %v32_v25 }
  0x2b   :  { %269 = vset.pattern.permute.xlu0 %v332_v9  ;;  %266 = vset.pattern.permute.xlu1 %v329_v6 }
  0x2c   :  { %98 = vperm.xlu1 %266, %v29_v3   ;;  %158 = vmatpush.msra.mxu0 %v31_v26 }
  0x2d   :  { %267 = vset.pattern.permute.xlu2 %v332_v9  ;;  %241 = vmatpush.msra.mxu1 %v31_v26 }
  0x2e   :  { %131 = vperm.xlu2 %267, %v28_v2   ;;  %159 = vmatpush.msra.mxu0 %v30_v27 }
  0x2f   :  { %242 = vmatpush.msra.mxu1 %v30_v27 }
  0x34   :  { %268 = vset.pattern.permute.xlu1 %v331_v8 }
  0x35   :  { %122 = vperm.xlu1 %268, %v29_v3  }
  0x36   :  { %134 = vperm.xlu2 %267, %v29_v3  }
  0x63   :  { %v360_v16 = vpop.permute.xlu2 %52 }
  0x64   :  { %vm55_vm8 = vcmp.eq.s32.totalorder %v360_v16, %v47_v32 }
  0x65   :  { %v57_v56 = vsel %vm55_vm8, 1, %v326_v1 }
  0x6d   :  { %v63_v22 = vpop.permute.xlu2 %62 }
  0x6e   :  { %vm65_vm9 = vcmp.eq.s32.totalorder %v63_v22, %v47_v32 }
  0x6f   :  { %v67_v57 = vsel %vm65_vm9, 1, %v326_v1 }
  0x70   :  { %v69_v58 = vadd.s32 %v67_v57, %v57_v56 }
  0x76   :  { %v75_v28 = vpop.permute.xlu2 %74 }
  0x77   :  { %vm77_vm10 = vcmp.eq.s32.totalorder %v75_v28, %v47_v32 }
  0x78   :  { %v79_v59 = vsel %vm77_vm10, 1, %v326_v1 }
  0x79   :  { %v81_v62 = vadd.s32 %v79_v59, %v69_v58 }
  0x7a   :  { %v72_v30 = vpop.permute.xlu1 %71 }
  0x7b   :  { %v50_v31 = vpop.permute.xlu0 %49  ;;  %vm76_vm2 = vcmp.eq.s32.totalorder %v72_v30, %v47_v32 }
  0x7c   :  { %vm54_vm0 = vcmp.eq.s32.totalorder %v50_v31, %v47_v32  ;;  %v78_v39 = vsel %vm76_vm2, 1, %v326_v1 }
  0x7d   :  { %v56_v34 = vsel %vm54_vm0, 1, %v326_v1  ;;  %vm171_vm0 = vcmask 1041408  }
  0x7f   :  { %v120_v33 = vpop.permute.xlu2 %119 }
  0x80   :  { %vm124_vm4 = vcmp.eq.s32.totalorder %v120_v33, %v47_v32 }
  0x81   :  { %v126_v49 = vsel %vm124_vm4, 1, %v326_v1 }
  0x83   :  { %v84_v35 = vpop.permute.xlu1 %83 }
  0x84   :  { %v60_v36 = vpop.permute.xlu0 %59  ;;  %vm88_vm3 = vcmp.eq.s32.totalorder %v84_v35, %v47_v32 }
  0x85   :  { %vm64_vm1 = vcmp.eq.s32.totalorder %v60_v36, %v47_v32  ;;  %v90_v42 = vsel %vm88_vm3, 1, %v326_v1 }
  0x86   :  { %v66_v37 = vsel %vm64_vm1, 1, %v326_v1 }
  0x87   :  { %v68_v38 = vadd.s32 %v66_v37, %v56_v34 }
  0x88   :  { %v132_v41 = vpop.permute.xlu2 %131 }
  0x89   :  { %v80_v40 = vadd.s32 %v78_v39, %v68_v38  ;;  %vm136_vm7 = vcmp.eq.s32.totalorder %v132_v41, %v47_v32 }
  0x8a   :  { %v138_v51 = vsel %vm136_vm7, 1, %v326_v1 }
  0x8b   :  { %v92_v45 = vadd.s32 %v90_v42, %v80_v40 }
  0x8c   :  { %v96_v43 = vpop.permute.xlu1 %95 }
  0x8d   :  { %v108_v44 = vpop.permute.xlu0 %107  ;;  %vm100_vm5 = vcmp.eq.s32.totalorder %v96_v43, %v47_v32 }
  0x8e   :  { %vm112_vm6 = vcmp.eq.s32.totalorder %v108_v44, %v47_v32  ;;  %v102_v46 = vsel %vm100_vm5, 1, %v326_v1 }
  0x8f   :  { %v114_v47 = vsel %vm112_vm6, 1, %v326_v1  ;;  %v104_v48 = vadd.s32 %v102_v46, %v92_v45 }
  0x90   :  { %v135_v4 = vpop.permute.xlu2 %134 }
  0x91   :  { %v116_v50 = vadd.s32 %v114_v47, %v104_v48  ;;  %vm137_vm14 = vcmp.eq.s32.totalorder %v135_v4, %v47_v32 }
  0x92   :  { %v139_v10 = vsel %vm137_vm14, 1, %v326_v1 }
  0x93   :  { %v128_v52 = vadd.s32 %v126_v49, %v116_v50 }
  0x95   :  { %v87_v53 = vpop.permute.xlu1 %86  ;;  %v140_v54 = vadd.s32 %v138_v51, %v128_v52  ;;  %v111_v63 = vpop.permute.xlu0 %110 }
  0x96   :  { %vm89_vm11 = vcmp.eq.s32.totalorder %v87_v53, %v47_v32  ;;  %vm113_vm13 = vcmp.eq.s32.totalorder %v111_v63, %v47_v32 }
  0x97   :  { %v142_v55 = vcvt.s32.f32 %v140_v54  ;;  %v91_v61 = vsel %vm89_vm11, 1, %v326_v1  ;;  %v115_v5 = vsel %vm113_vm13, 1, %v326_v1 }
  0x98   :  { %v93_v2 = vadd.s32 %v91_v61, %v81_v62 }
  0x99   :  { %160 = vmatmul.f32.vlgmr.msra.gmra.mxu0 %v142_v55 }
  0x9e   :  { %v99_v60 = vpop.permute.xlu1 %98 }
  0x9f   :  { %vm101_vm12 = vcmp.eq.s32.totalorder %v99_v60, %v47_v32 }
  0xa0   :  { %v103_v0 = vsel %vm101_vm12, 1, %v326_v1 }
  0xa1   :  { %v105_v3 = vadd.s32 %v103_v0, %v93_v2 }
  0xa3   :  { %v117_v7 = vadd.s32 %v115_v5, %v105_v3 }
  0xa7   :  { %v123_v6 = vpop.permute.xlu1 %122 }
  0xa8   :  { %vm125_vm15 = vcmp.eq.s32.totalorder %v123_v6, %v47_v32 }
  0xa9   :  { %v127_v8 = vsel %vm125_vm15, 1, %v326_v1 }
  0xaa   :  { %v129_v9 = vadd.s32 %v127_v8, %v117_v7 }
  0xac   :  { %v141_v11 = vadd.s32 %v139_v10, %v129_v9 }
  0xae   :  { %v143_v12 = vcvt.s32.f32 %v141_v11 }
  0xb0   :  { %163 = vmatmul.f32.vlgmr.msra.gmra.mxu1 %v143_v12 }
 0x116   :  { %v161_v13 = vpop.f32.mrf.mxu0 }
 0x117   :  { %v184_v14 = vrot.slane %v161_v13, 6  ;;  %v175_v15 = vrot.slane %v161_v13, 4  ;;  %v168_v16 = vrot.slane %v161_v13, 2 }
 0x119   :  { %v186_v17 = vmul.f32 %v184_v14, %v161_v13  ;;  %v177_v18 = vmul.f32 %v175_v15, %v161_v13  ;;  %v170_v19 = vmul.f32 %v168_v16, %v161_v13 }
 0x11b   :  { %v187_v20 = vsel %vm171_vm0, %v186_v17, 0.0  ;;  %v178_v21 = vsel %vm171_vm0, %v177_v18, 0.0  ;;  %v172_v22 = vsel %vm171_vm0, %v170_v19, 0.0 }
 0x11c   :  { %188 = vadd.xlane.f32.xlu2 %v187_v20  ;;  %179 = vadd.xlane.f32.xlu1 %v178_v21 }
 0x11d   :  { %173 = vadd.xlane.f32.xlu0 %v172_v22 }
 0x12d   :  { %v164_v23 = vpop.f32.mrf.mxu1 }
 0x12e   :  { %v193_v24 = vmul.f32 %v164_v23, %v161_v13  ;;  %v201_v25 = vrot.slane %v164_v23, 2 }
 0x130   :  { %v194_v26 = vsel %vm171_vm0, %v193_v24, 0.0  ;;  %v203_v27 = vmul.f32 %v201_v25, %v161_v13 }
 0x131   :  { %195 = vadd.xlane.f32.xlu2 %v194_v26 }
 0x132   :  { %v204_v28 = vsel %vm171_vm0, %v203_v27, 0.0 }
 0x133   :  { %205 = vadd.xlane.f32.xlu0 %v204_v28 }
 0x18f   :  { %v180_v29 = vpop.xlane.xlu1 %179  ;;  %v189_v31 = vpop.xlane.xlu2 %188 }
 0x190   :  { %v174_v30 = vpop.xlane.xlu0 %173 }
 0x191   :  { %vm181_vm1 = vcmp.gt.f32.partialorder %v180_v29, %v174_v30 }
 0x192   :  { %v183_v32 = vsel %vm181_vm1, %v180_v29, %v174_v30  ;;  %v182_v33 = vsel %vm181_vm1, 1, %v326_v1 }
 0x193   :  { %vm190_vm2 = vcmp.gt.f32.partialorder %v189_v31, %v183_v32 }
 0x194   :  { %v192_v35 = vsel %vm190_vm2, %v189_v31, %v183_v32  ;;  %v191_v36 = vsel %vm190_vm2, 2, %v182_v33 }
 0x1a4   :  { %v196_v34 = vpop.xlane.xlu2 %195 }
 0x1a5   :  { %vm197_vm3 = vcmp.gt.f32.partialorder %v196_v34, %v192_v35 }
 0x1a6   :  { %v198_v37 = vsel %vm197_vm3, 3, %v191_v36  ;;  %v199_v38 = vsel %vm197_vm3, %v196_v34, %v192_v35  ;;  %v206_v39 = vpop.xlane.xlu0 %205 }
 0x1a7   :  { %vm207_vm4 = vcmp.gt.f32.partialorder %v206_v39, %v199_v38 }
 0x1a8   :  { %v208_v40 = vsel %vm207_vm4, 4, %v198_v37 }
 0x1a9   :  { %209 = vst [vmem:[#allocation5] sm:$0x3] %v208_v40 }
 0x1aa   :  { %220 = dma.vmem_to_hbm [thread:$0]  %s216_s19, 32, %s218_s22, [#allocation4]  }
 0x1ab   :  { %320 = dma.done.wait [#allocation4], 32  }
 0x1ac   :  { %321 = vsyncadd [#allocation4], 4294967264 }
 0x1ad   :  { %225 = vsyncpa [#allocation3], 1 }
 0x1ae   :  { %226 = vsyncpa [#allocation4], 1 }

</bundles_post_ra>
